<compile_context>
chip_gen: v7x
topology: tpu7x:2x2x1
jax: 0.10.0
libtpu: 0.0.40
codegen_flags: <defaults>
</compile_context>

<pallas_src>
import jax
import jax.numpy as jnp
from jax import lax
from jax.experimental import pallas as pl
from jax.experimental.pallas import tpu as pltpu


def _round_up(a, b):
    return (a + b - 1) // b * b


def primary_caps_kernel(p_ref, w_ref, gd_ref, gu_ref, poses_ref, act_ref):
    """One (batch, L_out-tile): conv-as-matmul (+bias) + squash_v1 + activation.

    p_ref:     (1, K, TL)   im2col patches (with ones channel folded in)
    w_ref:     (CT, K)      fused conv weight (bias on the ones channel)
    gd_ref:    (OC, CT)     0/1 capsule group-sum matrix (down: CT -> OC)
    gu_ref:    (CT, OC)     0/1 broadcast matrix (up: OC -> CT)
    poses_ref: (1, CT, TL)
    act_ref:   (1, OC, TL)
    """
    p = p_ref[0]                                                       # (K, TL)

    # fused conv (+ bias) for all capsules in one MXU pass, lane-dense in TL
    u = jnp.dot(w_ref[...], p, preferred_element_type=jnp.float32)     # (CT, TL)

    # squared norm over the capsule axis -> one value per output channel j
    ssq = jnp.dot(gd_ref[...], u * u,
                  preferred_element_type=jnp.float32)                  # (OC, TL)

    r = pl.reciprocal(0.5 + ssq, approx=False)                         # (OC, TL)
    scale_small = jnp.sqrt(ssq) * r                                    # squash scale
    # |poses| over caps == scale * sqrt(ssq) == ssq/(0.5+ssq): no 2nd pass/sqrt
    act_ref[0] = ssq * r                                               # (OC, TL)

    # broadcast the per-channel scale back to all CT conv channels via one
    # skinny 0/1 matmul (stays dense, no sublane shuffles), then scale u.
    scale_full = jnp.dot(gu_ref[...], scale_small,
                         preferred_element_type=jnp.float32)           # (CT, TL)
    poses_ref[0] = u * scale_full                                      # (CT, TL)


def primary_caps_forward(x, weight, bias, *, num_capsules, out_channels,
                         kernel_size, stride, block_l=2048):
    """x: (B, Cin, L) f32; weight: (num_caps*out_ch, Cin, k); bias: (num_caps*out_ch,)."""
    B, Cin, L = x.shape
    k = kernel_size
    oc = out_channels
    CT = num_capsules * oc
    L_out = (L - k) // stride + 1

    # --- glue (plain JAX, no large relayouts) ---
    # Fold the bias into the matmul: append a constant-ones channel to x and a
    # matching weight channel whose first tap is the bias (others zero).
    x_aug = jnp.concatenate([x, jnp.ones((B, 1, L), x.dtype)], axis=1)  # (B, Cin+1, L)
    Cin_a = Cin + 1
    K = Cin_a * k

    # im2col directly in (channel, tap, position) order -> (B, K, L_out);
    # merging (Cin_a, k) is a free reshape, no transpose of the big array.
    pos = jnp.arange(k)[:, None] + jnp.arange(L_out)[None, :] * stride  # (k, L_out)
    patches = x_aug[:, :, pos].reshape(B, K, L_out)                     # (B, K, L_out)

    # Fused weight (CT, Cin_a, k) -> (CT, K); conv channel c = cap*oc + j
    # matches the torch .view(num_caps, oc, ...) order, so no per-capsule shuffle.
    w_bias = jnp.zeros((CT, 1, k), weight.dtype).at[:, 0, 0].set(bias)
    w_fused = jnp.concatenate([weight, w_bias], axis=1).reshape(CT, K)  # (CT, K)

    # 0/1 capsule-group matrices: column/row c belongs to output channel c % oc.
    chan = jnp.arange(CT) % oc
    g_down = (jnp.arange(oc)[:, None] == chan[None, :]).astype(jnp.float32)  # (oc, CT)
    g_up = g_down.T                                                          # (CT, oc)

    # --- L_out tiling (grid = (B, L-tiles); both axes independent/"parallel") ---
    if L_out <= block_l:
        tl = L_out                    # full-dim block: no padding, no post-slice
        l_pad = L_out
    else:
        tl = max(128, (block_l // 128) * 128)   # tiled blocks must be 128-multiples
        l_pad = _round_up(L_out, tl)
        patches = jnp.pad(patches, ((0, 0), (0, 0), (0, l_pad - L_out)))
    grid = (B, l_pad // tl)

    # --- hot path in Pallas ---
    poses_f, act_f = pl.pallas_call(
        primary_caps_kernel,
        out_shape=(
            jax.ShapeDtypeStruct((B, CT, l_pad), jnp.float32),
            jax.ShapeDtypeStruct((B, oc, l_pad), jnp.float32),
        ),
        grid=grid,
        in_specs=[
            pl.BlockSpec((1, K, tl), lambda b, li: (b, 0, li)),    # patches tile
            pl.BlockSpec((CT, K), lambda b, li: (0, 0)),           # fused weights
            pl.BlockSpec((oc, CT), lambda b, li: (0, 0)),          # group-sum (down)
            pl.BlockSpec((CT, oc), lambda b, li: (0, 0)),          # broadcast (up)
        ],
        out_specs=(
            pl.BlockSpec((1, CT, tl), lambda b, li: (b, 0, li)),   # poses, lane-dense
            pl.BlockSpec((1, oc, tl), lambda b, li: (b, 0, li)),   # activations
        ),
        compiler_params=pltpu.CompilerParams(
            dimension_semantics=("parallel", "parallel")),         # v7x: 2 TCs share grid
    )(patches, w_fused, g_down, g_up)

    if l_pad != L_out:
        poses_f = poses_f[:, :, :L_out]
        act_f = act_f[:, :, :L_out]

    # --- glue: PyTorch output shapes are pure reshapes (no transpose) ---
    poses = poses_f.reshape(B, num_capsules, oc, L_out, 1)
    activations = act_f.reshape(B, oc, L_out, 1)
    return poses, activations


def primary_caps_reference(x, weight, bias, *, num_capsules, out_channels,
                           kernel_size, stride):
    """Pure-JAX reference mirroring the PyTorch forward."""
    u = lax.conv_general_dilated(
        x, weight, window_strides=(stride,), padding="VALID",
        dimension_numbers=("NCH", "OIH", "NCH"),
        precision=lax.Precision.HIGHEST)
    u = u + bias[None, :, None]
    B = x.shape[0]
    u = u.reshape(B, num_capsules, out_channels, -1, 1)
    ssq = (u ** 2).sum(axis=1, keepdims=True)
    scale = jnp.sqrt(ssq) / (0.5 + ssq)
    poses = scale * u
    activations = jnp.sqrt((poses ** 2).sum(axis=1))
    return poses, activations


if __name__ == "__main__":
    # small, module-consistent sizes
    num_capsules = 8
    in_channels = 4
    out_channels = 16
    kernel_size = 3
    stride = 2
    B, L = 2, 16

    key = jax.random.PRNGKey(0)
    kx, kw, kb = jax.random.split(key, 3)

    x = jax.random.normal(kx, (B, in_channels, L), dtype=jnp.float32)

    # Conv1d weight: (out_ch*num_caps, in_ch, k), xavier_uniform init
    c_out_total = out_channels * num_capsules
    fan_in = in_channels * kernel_size
    fan_out = c_out_total * kernel_size
    xavier_bound = (6.0 / (fan_in + fan_out)) ** 0.5
    weight = jax.random.uniform(kw, (c_out_total, in_channels, kernel_size),
                                minval=-xavier_bound, maxval=xavier_bound,
                                dtype=jnp.float32)
    # Conv1d bias default init: U(-1/sqrt(fan_in), 1/sqrt(fan_in))
    b_bound = 1.0 / (fan_in ** 0.5)
    bias = jax.random.uniform(kb, (c_out_total,), minval=-b_bound,
                              maxval=b_bound, dtype=jnp.float32)

    poses, activations = primary_caps_forward(
        x, weight, bias, num_capsules=num_capsules, out_channels=out_channels,
        kernel_size=kernel_size, stride=stride)
    jax.block_until_ready(poses)
    jax.block_until_ready(activations)

    poses_ref, act_ref = primary_caps_reference(
        x, weight, bias, num_capsules=num_capsules, out_channels=out_channels,
        kernel_size=kernel_size, stride=stride)

    L_out = (L - kernel_size) // stride + 1
    assert poses.shape == poses_ref.shape == (B, num_capsules, out_channels, L_out, 1)
    assert activations.shape == act_ref.shape == (B, out_channels, L_out, 1)
    assert jnp.allclose(poses, poses_ref, rtol=1e-5, atol=1e-5)
    assert jnp.allclose(activations, act_ref, rtol=1e-5, atol=1e-5)

    print("KERNEL_OK")
</pallas_src>

<mosaic_0001>
module attributes {stable_mosaic.version = 11 : i64} {
  func.func @primary_caps_kernel(%arg0: i32, %arg1: i32, %arg2: memref<1x15x7xf32, #tpu.memory_space<vmem>>, %arg3: memref<128x15xf32, #tpu.memory_space<vmem>>, %arg4: memref<16x128xf32, #tpu.memory_space<vmem>>, %arg5: memref<128x16xf32, #tpu.memory_space<vmem>>, %arg6: memref<1x128x7xf32, #tpu.memory_space<vmem>>, %arg7: memref<1x16x7xf32, #tpu.memory_space<vmem>>) attributes {dimension_semantics = [#tpu.dimension_semantics<parallel>, #tpu.dimension_semantics<parallel>], iteration_bounds = array<i64: 2, 1>, scalar_prefetch = 0 : i64, scratch_operands = 0 : i64, tpu.core_type = #tpu.core_type<tc>, window_params = [{transform_indices = @transform_0, window_bounds = array<i64: 1, 15, 7>}, {pipeline_mode = #tpu.pipeline_mode<synchronous>, transform_indices = @transform_1, window_bounds = array<i64: 128, 15>}, {pipeline_mode = #tpu.pipeline_mode<synchronous>, transform_indices = @transform_2, window_bounds = array<i64: 16, 128>}, {pipeline_mode = #tpu.pipeline_mode<synchronous>, transform_indices = @transform_3, window_bounds = array<i64: 128, 16>}, {transform_indices = @transform_4, window_bounds = array<i64: 1, 128, 7>}, {transform_indices = @transform_5, window_bounds = array<i64: 1, 16, 7>}]} {
    %c0 = arith.constant 0 : index
    %c0_0 = arith.constant 0 : index
    %c0_1 = arith.constant 0 : index
    %0 = vector.load %arg2[%c0, %c0_0, %c0_1] : memref<1x15x7xf32, #tpu.memory_space<vmem>>, vector<1x15x7xf32>
    %1 = vector.shape_cast %0 : vector<1x15x7xf32> to vector<15x7xf32>
    %c0_2 = arith.constant 0 : index
    %c0_3 = arith.constant 0 : index
    %2 = vector.load %arg3[%c0_2, %c0_3] : memref<128x15xf32, #tpu.memory_space<vmem>>, vector<128x15xf32>
    %cst = arith.constant dense<0.000000e+00> : vector<128x7xf32>
    %3 = tpu.matmul %2, %1, %cst {dimension_numbers = #tpu.dot_dimension_numbers<[1], [0], [0], [1], [0, 0, 1, 1], [], []>} : vector<128x15xf32>, vector<15x7xf32>, vector<128x7xf32> -> vector<128x7xf32>
    %c0_4 = arith.constant 0 : index
    %c0_5 = arith.constant 0 : index
    %4 = vector.load %arg4[%c0_4, %c0_5] : memref<16x128xf32, #tpu.memory_space<vmem>>, vector<16x128xf32>
    %5 = arith.mulf %3, %3 : vector<128x7xf32>
    %cst_6 = arith.constant dense<0.000000e+00> : vector<16x7xf32>
    %6 = tpu.matmul %4, %5, %cst_6 {dimension_numbers = #tpu.dot_dimension_numbers<[1], [0], [0], [1], [0, 0, 1, 1], [], []>} : vector<16x128xf32>, vector<128x7xf32>, vector<16x7xf32> -> vector<16x7xf32>
    %cst_7 = arith.constant 5.000000e-01 : f32
    %7 = vector.broadcast %cst_7 : f32 to vector<16x7xf32>
    %8 = arith.addf %7, %6 : vector<16x7xf32>
    %9 = tpu.reciprocal %8 : vector<16x7xf32> -> vector<16x7xf32>
    %10 = math.sqrt %6 : vector<16x7xf32>
    %11 = arith.mulf %10, %9 : vector<16x7xf32>
    %12 = arith.mulf %6, %9 : vector<16x7xf32>
    %c0_8 = arith.constant 0 : index
    %c0_9 = arith.constant 0 : index
    %c0_10 = arith.constant 0 : index
    %13 = vector.load %arg7[%c0_8, %c0_9, %c0_10] : memref<1x16x7xf32, #tpu.memory_space<vmem>>, vector<1x16x7xf32>
    %14 = vector.shape_cast %13 : vector<1x16x7xf32> to vector<16x7xf32>
    %15 = vector.shape_cast %12 : vector<16x7xf32> to vector<1x16x7xf32>
    tpu.vector_store %arg7[%c0_8, %c0_9, %c0_10], %15 {strides = array<i32>} : memref<1x16x7xf32, #tpu.memory_space<vmem>>, vector<1x16x7xf32>,
    %c0_11 = arith.constant 0 : index
    %c0_12 = arith.constant 0 : index
    %16 = vector.load %arg5[%c0_11, %c0_12] : memref<128x16xf32, #tpu.memory_space<vmem>>, vector<128x16xf32>
    %cst_13 = arith.constant dense<0.000000e+00> : vector<128x7xf32>
    %17 = tpu.matmul %16, %11, %cst_13 {dimension_numbers = #tpu.dot_dimension_numbers<[1], [0], [0], [1], [0, 0, 1, 1], [], []>} : vector<128x16xf32>, vector<16x7xf32>, vector<128x7xf32> -> vector<128x7xf32>
    %18 = arith.mulf %3, %17 : vector<128x7xf32>
    %c0_14 = arith.constant 0 : index
    %c0_15 = arith.constant 0 : index
    %c0_16 = arith.constant 0 : index
    %19 = vector.load %arg6[%c0_14, %c0_15, %c0_16] : memref<1x128x7xf32, #tpu.memory_space<vmem>>, vector<1x128x7xf32>
    %20 = vector.shape_cast %19 : vector<1x128x7xf32> to vector<128x7xf32>
    %21 = vector.shape_cast %18 : vector<128x7xf32> to vector<1x128x7xf32>
    tpu.vector_store %arg6[%c0_14, %c0_15, %c0_16], %21 {strides = array<i32>} : memref<1x128x7xf32, #tpu.memory_space<vmem>>, vector<1x128x7xf32>,
    return
  }
  func.func @transform_0(%arg0: i32, %arg1: i32) -> (i32, i32, i32) {
    %c0_i32 = arith.constant 0 : i32
    %c0_i32_0 = arith.constant 0 : i32
    return %arg0, %c0_i32, %arg1 : i32, i32, i32
  }
  func.func @transform_1(%arg0: i32, %arg1: i32) -> (i32, i32) {
    %c0_i32 = arith.constant 0 : i32
    %c0_i32_0 = arith.constant 0 : i32
    %c0_i32_1 = arith.constant 0 : i32
    return %c0_i32, %c0_i32_0 : i32, i32
  }
  func.func @transform_2(%arg0: i32, %arg1: i32) -> (i32, i32) {
    %c0_i32 = arith.constant 0 : i32
    %c0_i32_0 = arith.constant 0 : i32
    %c0_i32_1 = arith.constant 0 : i32
    return %c0_i32, %c0_i32_0 : i32, i32
  }
  func.func @transform_3(%arg0: i32, %arg1: i32) -> (i32, i32) {
    %c0_i32 = arith.constant 0 : i32
    %c0_i32_0 = arith.constant 0 : i32
    %c0_i32_1 = arith.constant 0 : i32
    return %c0_i32, %c0_i32_0 : i32, i32
  }
  func.func @transform_4(%arg0: i32, %arg1: i32) -> (i32, i32, i32) {
    %c0_i32 = arith.constant 0 : i32
    %c0_i32_0 = arith.constant 0 : i32
    return %arg0, %c0_i32, %arg1 : i32, i32, i32
  }
  func.func @transform_5(%arg0: i32, %arg1: i32) -> (i32, i32, i32) {
    %c0_i32 = arith.constant 0 : i32
    %c0_i32_0 = arith.constant 0 : i32
    return %arg0, %c0_i32, %arg1 : i32, i32, i32
  }
}

</mosaic_0001>

<bundles_post_ra>
// kernel: tpu_custom_call.1
= control target key start
LH: loop header
LB: loop body
LE: loop exit
PB: predicated region body
PF: predicated region fallthrough
CT: control target
= control target key end

     0   :  { %s1307_s18 = smov 0   ;;  %s1309_s19 = smov 0   ;;  %s1601_s0 = inlined_call_operand.vmem [shape: f32[2,15,7], index: 0, kind: input, shape index: {}]   ;;  %s1602_s1 = inlined_call_operand.vmem [shape: f32[128,15], index: 1, kind: input, shape index: {}]   ;;  %s1603_s2 = inlined_call_operand.vmem [shape: f32[16,128], index: 2, kind: input, shape index: {}]   ;;  %s1604_s3 = inlined_call_operand.vmem [shape: f32[128,16], index: 3, kind: input, shape index: {}]   ;;  %s1605_s4 = inlined_call_operand.vmem [shape: f32[2,128,7], index: 4, kind: output, shape index: {0}]   ;;  %s1606_s5 = inlined_call_operand.vmem [shape: f32[2,16,7], index: 5, kind: output, shape index: {1}]  }
   0x1   :  { %s1311_s20 = smov 0  }
   0x2 LB: > { %s28_s21 = sadd.s32 1, %s1270_s19  ;;  %p987_p0 = scmp.ge.s32.totalorder %s1274_s20, 1  ;;  %s1274_s20 = sphi %s1311_s20, %s16_s20   ;;  %s1270_s19 = sphi %s1309_s19, %s1608_s19   ;;  %s1266_s18 = sphi %s1307_s18, %s1607_s18  }
   0x3   : > { %p30_p1 = scmp.ge.s32.totalorder %s28_s21, 2  ;;  %p211_p2 = scmp.lt.s32.totalorder %s1274_s20, 3 }
   0x5   : > { %s1610_s21 = smov (%p30_p1, %s28_s21), 0  ;;  %p212_p3 = pnand %p987_p0, %p211_p2 }
   0x6   : > { %p253_p4 = scmp.lt.s32.totalorder (!%p212_p3), %s1266_s18, 1  ;;  %v279_v0 = vld [vmem:[%s1602_s1] sm:$0xff] (!%p212_p3)  ;;  %vm295_vm0 = vcmask (!%p212_p3), 121856   ;;  %vm344_vm1 = vcmask (!%p212_p3), 1046528   ;;  %vm1276_vm2 = vmmov (!%p212_p3), 1   ;;  %v280_v4 = vld [vmem:[%s1602_s1 + $0x8] sm:$0xff] (!%p212_p3) }
   0x7   : > { %215 = sbr.rel (%p212_p3) target bundleno = 753 (0x2f1), region = 36  ;;  %1090 = vmatprep.mubr.msk.f32.mxu1 (!%p212_p3), %vm295_vm0, %v279_v0  ;;  %vm1178_vm3 = vmpackc.low (!%p212_p3), %vm344_vm1, %vm1276_vm2  ;;  %v281_v5 = vld [vmem:[%s1602_s1 + $0x10] sm:$0xff] (!%p212_p3)  ;;  %v282_v6 = vld [vmem:[%s1602_s1 + $0x18] sm:$0xff] (!%p212_p3)  ;;  %vm627_vm4 = vcmask (!%p212_p3), 130048   ;;  %vm608_vm5 = vcmask (!%p212_p3), 56320  }
   0x8   : > { %v283_v7 = vld [vmem:[%s1602_s1 + $0x20] sm:$0xff] (!%p212_p3)  ;;  %v284_v8 = vld [vmem:[%s1602_s1 + $0x28] sm:$0xff] (!%p212_p3)  ;;  %v285_v9 = vld [vmem:[%s1602_s1 + $0x30] sm:$0xff] (!%p212_p3) }
   0x9   : > { %v286_v10 = vld [vmem:[%s1602_s1 + $0x38] sm:$0xff] (!%p212_p3)  ;;  %v287_v11 = vld [vmem:[%s1602_s1 + $0x40] sm:$0xff] (!%p212_p3)  ;;  %v288_v12 = vld [vmem:[%s1602_s1 + $0x48] sm:$0xff] (!%p212_p3) }
   0xa   : > { %v289_v13 = vld [vmem:[%s1602_s1 + $0x50] sm:$0xff] (!%p212_p3)  ;;  %v290_v14 = vld [vmem:[%s1602_s1 + $0x58] sm:$0xff] (!%p212_p3)  ;;  %v291_v15 = vld [vmem:[%s1602_s1 + $0x60] sm:$0xff] (!%p212_p3) }
   0xb   : > { %v292_v16 = vld [vmem:[%s1602_s1 + $0x68] sm:$0xff] (!%p212_p3)  ;;  %v293_v17 = vld [vmem:[%s1602_s1 + $0x70] sm:$0xff] (!%p212_p3)  ;;  %v294_v18 = vld [vmem:[%s1602_s1 + $0x78] sm:$0xff] (!%p212_p3) }
   0xc   : > { %v493_v19 = vld [vmem:[%s1603_s2] sm:$0xff] (!%p212_p3)  ;;  %v494_v60 = vld [vmem:[%s1603_s2 + $0x8] sm:$0xff] (!%p212_p3) }
   0xd   : > { %v611_v61 = vld [vmem:[%s1604_s3] sm:$0xff] (!%p212_p3) }
   0xe   : > { %s1612_s18 = smov (!%p253_p4, %s1266_s18), 1  ;;  %1153 = vmatprep.mubr.msk.f32.mxu0 %vm627_vm4, %v611_v61 }
   0xf   : > { %s1029_s24 = sshll.u32 %s1612_s18, 4  ;;  %s1030_s10 = sshll.u32 %s1612_s18, 7 }
  0x10   : > { %s260_s27 = scalar_lea.vmem %s1601_s0, %s1029_s24  ;;  %s276_s26 = scalar_lea.vmem %s1606_s5, %s1029_s24 }
  0x11   : > { %v277_v1 = vld [vmem:[%s260_s27] sm:$0xff]  ;;  %v278_v2 = vld [vmem:[%s260_s27 + $0x8] sm:$0x7f]  ;;  %s1542_s13 = scalar_lea.vmem %s1605_s4, %s1030_s10 }
  0x12   : > { %v1177_v3 = vpack.c.bf16 %v278_v2, %v277_v1 }
  0x14   : > { %1179 = vmatprep.subr.msk.bf16.mxu1 %vm1178_vm3, %v1177_v3 }
  0x15   : > { %1182 = vmatpush3.bf16.msk.msra.mxu1 %vm1178_vm3, %v1177_v3 }
  0x18   : > { %1091 = vmatmul.mubr.msk.f32.vlgmr.msra.gmra.mrb[0].mxu1 %vm295_vm0, %v280_v4 }
  0x19   : > { %1093 = vmatprep.mubr.msk.f32.mxu1 %vm295_vm0, %v281_v5 }
  0x1c   : > { %1094 = vmatmul.mubr.msk.f32.gmra.mrb[2].mxu1 %vm295_vm0, %v282_v6 }
  0x1d   : > { %1096 = vmatprep.mubr.msk.f32.mxu1 %vm295_vm0, %v283_v7 }
  0x20   : > { %1097 = vmatmul.mubr.msk.f32.gmra.mrb[4].mxu1 %vm295_vm0, %v284_v8 }
  0x21   : > { %1099 = vmatprep.mubr.msk.f32.mxu1 %vm295_vm0, %v285_v9 }
  0x24   : > { %1100 = vmatmul.mubr.msk.f32.gmra.mrb[6].mxu1 %vm295_vm0, %v286_v10 }
  0x25   : > { %1102 = vmatprep.mubr.msk.f32.mxu1 %vm295_vm0, %v287_v11 }
  0x28   : > { %1103 = vmatmul.mubr.msk.f32.gmra.mrb[8].mxu1 %vm295_vm0, %v288_v12 }
  0x29   : > { %1105 = vmatprep.mubr.msk.f32.mxu1 %vm295_vm0, %v289_v13 }
  0x2c   : > { %1106 = vmatmul.mubr.msk.f32.gmra.mrb[10].mxu1 %vm295_vm0, %v290_v14 }
  0x2d   : > { %1108 = vmatprep.mubr.msk.f32.mxu1 %vm295_vm0, %v291_v15 }
  0x30   : > { %1109 = vmatmul.mubr.msk.f32.gmra.mrb[12].mxu1 %vm295_vm0, %v292_v16 }
  0x31   : > { %1111 = vmatprep.mubr.msk.f32.mxu1 %vm295_vm0, %v293_v17 }
  0x34   : > { %1112 = vmatmul.mubr.msk.f32.gmra.mrb[14].mxu1 %vm295_vm0, %v294_v18 }
  0x35   : > { %1146 = vmatprep.mubr.f32.mxu1 %v493_v19  ;;  %v612_v19 = vld [vmem:[%s1604_s3 + $0x8] sm:$0xff] }
  0xeb   : > { %v1400_v20 = vpop.f32.mrb[0].mxu1 }
  0xec   : > { %v496_v21 = vmul.f32 %v1400_v20, %v1400_v20  ;;  %v1404_v22 = vpop.f32.mrb[1].mxu1 }
  0xed   : > { %v495_v23 = vmul.f32 %v1404_v22, %v1404_v22 }
  0xef   : > { %v1183_v24 = vpack.c.bf16 %v496_v21, %v495_v23  ;;  %v1408_v25 = vpop.f32.mrb[2].mxu1  ;;  %v613_v21 = vld [vmem:[%s1604_s3 + $0x10] sm:$0xff]  ;;  %v614_v23 = vld [vmem:[%s1604_s3 + $0x18] sm:$0xff] }
  0xf0   : > { %v498_v26 = vmul.f32 %v1408_v25, %v1408_v25  ;;  %v1412_v27 = vpop.f32.mrb[3].mxu1 }
  0xf1   : > { %v497_v28 = vmul.f32 %v1412_v27, %v1412_v27  ;;  %1184 = vmatprep.subr.bf16.mxu1 %v1183_v24 }
  0xf2   : > { %1186 = vmatpush3.bf16.msra.mxu1 %v1183_v24  ;;  %v615_v24 = vld [vmem:[%s1604_s3 + $0x20] sm:$0xff] }
  0xf3   : > { %v1187_v29 = vpack.c.bf16 %v498_v26, %v497_v28  ;;  %v1416_v30 = vpop.f32.mrb[4].mxu1  ;;  %v616_v26 = vld [vmem:[%s1604_s3 + $0x28] sm:$0xff]  ;;  %v617_v28 = vld [vmem:[%s1604_s3 + $0x30] sm:$0xff] }
  0xf4   : > { %v500_v31 = vmul.f32 %v1416_v30, %v1416_v30  ;;  %v1420_v32 = vpop.f32.mrb[5].mxu1 }
  0xf5   : > { %v499_v33 = vmul.f32 %v1420_v32, %v1420_v32  ;;  %1188 = vmatprep.subr.bf16.mxu1 %v1187_v29 }
  0xf6   : > { %1190 = vmatpush3.bf16.msra.mxu1 %v1187_v29  ;;  %v618_v29 = vld [vmem:[%s1604_s3 + $0x38] sm:$0xff] }
  0xf7   : > { %v1191_v34 = vpack.c.bf16 %v500_v31, %v499_v33  ;;  %v1424_v35 = vpop.f32.mrb[6].mxu1  ;;  %v619_v31 = vld [vmem:[%s1604_s3 + $0x40] sm:$0xff]  ;;  %v620_v33 = vld [vmem:[%s1604_s3 + $0x48] sm:$0xff] }
  0xf8   : > { %v502_v36 = vmul.f32 %v1424_v35, %v1424_v35  ;;  %v1428_v37 = vpop.f32.mrb[7].mxu1 }
  0xf9   : > { %v501_v38 = vmul.f32 %v1428_v37, %v1428_v37  ;;  %1192 = vmatprep.subr.bf16.mxu1 %v1191_v34 }
  0xfa   : > { %1194 = vmatpush3.bf16.msra.mxu1 %v1191_v34  ;;  %v621_v34 = vld [vmem:[%s1604_s3 + $0x50] sm:$0xff] }
  0xfb   : > { %v1195_v39 = vpack.c.bf16 %v502_v36, %v501_v38  ;;  %v1432_v40 = vpop.f32.mrb[8].mxu1  ;;  %v622_v36 = vld [vmem:[%s1604_s3 + $0x58] sm:$0xff]  ;;  %v623_v38 = vld [vmem:[%s1604_s3 + $0x60] sm:$0xff] }
  0xfc   : > { %v504_v41 = vmul.f32 %v1432_v40, %v1432_v40  ;;  %v1436_v42 = vpop.f32.mrb[9].mxu1 }
  0xfd   : > { %v503_v43 = vmul.f32 %v1436_v42, %v1436_v42  ;;  %1196 = vmatprep.subr.bf16.mxu1 %v1195_v39 }
  0xfe   : > { %1198 = vmatpush3.bf16.msra.mxu1 %v1195_v39  ;;  %v624_v39 = vld [vmem:[%s1604_s3 + $0x68] sm:$0xff] }
  0xff   : > { %v1199_v44 = vpack.c.bf16 %v504_v41, %v503_v43  ;;  %v1440_v45 = vpop.f32.mrb[10].mxu1  ;;  %v625_v41 = vld [vmem:[%s1604_s3 + $0x70] sm:$0xff]  ;;  %v626_v43 = vld [vmem:[%s1604_s3 + $0x78] sm:$0xff] }
 0x100   : > { %v506_v46 = vmul.f32 %v1440_v45, %v1440_v45  ;;  %v1444_v47 = vpop.f32.mrb[11].mxu1 }
 0x101   : > { %v505_v48 = vmul.f32 %v1444_v47, %v1444_v47  ;;  %1200 = vmatprep.subr.bf16.mxu1 %v1199_v44 }
 0x102   : > { %1202 = vmatpush3.bf16.msra.mxu1 %v1199_v44 }
 0x103   : > { %v1203_v49 = vpack.c.bf16 %v506_v46, %v505_v48  ;;  %v1448_v50 = vpop.f32.mrb[12].mxu1 }
 0x104   : > { %v508_v51 = vmul.f32 %v1448_v50, %v1448_v50  ;;  %v1452_v52 = vpop.f32.mrb[13].mxu1 }
 0x105   : > { %v507_v53 = vmul.f32 %v1452_v52, %v1452_v52  ;;  %1204 = vmatprep.subr.bf16.mxu1 %v1203_v49 }
 0x106   : > { %1206 = vmatpush3.bf16.msra.mxu1 %v1203_v49 }
 0x107   : > { %v1207_v54 = vpack.c.bf16 %v508_v51, %v507_v53  ;;  %v1456_v55 = vpop.f32.mrb[14].mxu1 }
 0x108   : > { %v510_v56 = vmul.f32 %v1456_v55, %v1456_v55  ;;  %v1460_v57 = vpop.f32.mrb[15].mxu1 }
 0x109   : > { %v509_v58 = vmul.f32 %v1460_v57, %v1460_v57  ;;  %1208 = vmatprep.subr.bf16.mxu1 %v1207_v54 }
 0x10a   : > { %1210 = vmatpush3.bf16.msra.mxu1 %v1207_v54 }
 0x10b   : > { %v1211_v59 = vpack.c.bf16 %v510_v56, %v509_v58 }
 0x10d   : > { %1212 = vmatprep.subr.bf16.mxu1 %v1211_v59 }
 0x10e   : > { %1214 = vmatpush3.bf16.msra.mxu1 %v1211_v59 }
 0x111   : > { %1147 = vmatmul.mubr.f32.vlgmr.msra.gmra.mrb[16].mxu1 %v494_v60 }
 0x1e4   : > { %v1148_v62 = vpop.f32.mrb[16].mxu1 }
 0x1e5   : > { %1244 = vrsqrt.f32 %v1148_v62  ;;  %v577_v63 = vpop.f32.mrb[17].mxu1  ;;  %v587_v0 = vadd.f32 0.5, %v1148_v62  ;;  %vm599_vm6 = vcmp.eq.f32.partialorder %v1148_v62, inf  ;;  %vm601_vm7 = vcmp.eq.f32.partialorder %v1148_v62, 0.0 }
 0x1e6   : > { %1246 = vrsqrt.f32 %v577_v63  ;;  %v586_v1 = vadd.f32 0.5, %v577_v63  ;;  %v602_v7 = vand.u32 2147483648, %v1148_v62  ;;  %vm592_vm8 = vcmp.eq.f32.partialorder %v577_v63, inf }
 0x1e7   : > { %1248 = vrcp.f32 %v587_v0  ;;  %v595_v9 = vand.u32 2147483648, %v577_v63  ;;  %vm594_vm9 = vcmp.eq.f32.partialorder %v577_v63, 0.0 }
 0x1e8   : > { %1250 = vrcp.f32 %v586_v1 }
 0x1ef   : > { %v1245_v2 = vpop.eup %1244 }
 0x1f0   : > { %v1247_v3 = vpop.eup %1246  ;;  %v598_v4 = vmul.f32 %v1245_v2, %v1148_v62 }
 0x1f1   : > { %v1249_v5 = vpop.eup %1248  ;;  %v591_v6 = vmul.f32 %v1247_v3, %v577_v63 }
 0x1f2   : > { %v1251_v8 = vpop.eup %1250  ;;  %v600_v10 = vsel %vm599_vm6, %v1148_v62, %v598_v4  ;;  %v607_v11 = vmul.f32 %v1249_v5, %v1148_v62 }
 0x1f3   : > { %v593_v12 = vsel %vm592_vm8, %v577_v63, %v591_v6  ;;  %v603_v13 = vsel %vm601_vm7, %v602_v7, %v600_v10  ;;  %v606_v14 = vmul.f32 %v1251_v8, %v577_v63 }
 0x1f4   : > { %v596_v15 = vsel %vm594_vm9, %v595_v9, %v593_v12  ;;  %v605_v16 = vmul.f32 %v1249_v5, %v603_v13  ;;  %610 = vst.msk [vmem:[%s276_s26 + $0x8] sm:$0xff] %vm608_vm5, %v607_v11 }
 0x1f5   : > { %v604_v17 = vmul.f32 %v1251_v8, %v596_v15  ;;  %609 = vst.msk [vmem:[%s276_s26] sm:$0xff] %vm608_vm5, %v606_v14 }
 0x1f7   : > { %v1215_v18 = vpack.c.bf16 %v605_v16, %v604_v17 }
 0x1f9   : > { %1216 = vmatprep.subr.bf16.mxu0 %v1215_v18 }
 0x1fa   : > { %1218 = vmatpush3.bf16.msra.mxu0 %v1215_v18 }
 0x1fd   : > { %1154 = vmatmul.mubr.msk.f32.vlgmr.msra.gmra.mrb[0].mxu0 %vm627_vm4, %v612_v19 }
 0x1fe   : > { %1156 = vmatprep.mubr.msk.f32.mxu0 %vm627_vm4, %v613_v21 }
 0x201   : > { %1157 = vmatmul.mubr.msk.f32.gmra.mrb[2].mxu0 %vm627_vm4, %v614_v23 }
 0x202   : > { %1159 = vmatprep.mubr.msk.f32.mxu0 %vm627_vm4, %v615_v24 }
 0x205   : > { %1160 = vmatmul.mubr.msk.f32.gmra.mrb[4].mxu0 %vm627_vm4, %v616_v26 }
 0x206   : > { %1162 = vmatprep.mubr.msk.f32.mxu0 %vm627_vm4, %v617_v28 }
 0x209   : > { %1163 = vmatmul.mubr.msk.f32.gmra.mrb[6].mxu0 %vm627_vm4, %v618_v29 }
 0x20a   : > { %1165 = vmatprep.mubr.msk.f32.mxu0 %vm627_vm4, %v619_v31 }
 0x20d   : > { %1166 = vmatmul.mubr.msk.f32.gmra.mrb[8].mxu0 %vm627_vm4, %v620_v33 }
 0x20e   : > { %1168 = vmatprep.mubr.msk.f32.mxu0 %vm627_vm4, %v621_v34 }
 0x211   : > { %1169 = vmatmul.mubr.msk.f32.gmra.mrb[10].mxu0 %vm627_vm4, %v622_v36 }
 0x212   : > { %1171 = vmatprep.mubr.msk.f32.mxu0 %vm627_vm4, %v623_v38 }
 0x215   : > { %1172 = vmatmul.mubr.msk.f32.gmra.mrb[12].mxu0 %vm627_vm4, %v624_v39 }
 0x216   : > { %1174 = vmatprep.mubr.msk.f32.mxu0 %vm627_vm4, %v625_v41 }
 0x219   : > { %1175 = vmatmul.mubr.msk.f32.gmra.mrb[14].mxu0 %vm627_vm4, %v626_v43 }
 0x2d0   : > { %v1155_v44 = vpop.f32.mrb[0].mxu0 }
 0x2d1   : > { %v822_v46 = vmul.f32 %v1155_v44, %v1400_v20  ;;  %v742_v48 = vpop.f32.mrb[1].mxu0 }
 0x2d2   : > { %v821_v49 = vmul.f32 %v742_v48, %v1404_v22 }
 0x2d3   : > { %838 = vst.msk [vmem:[%s1542_s13 + $0x8] sm:$0xff] %vm608_vm5, %v822_v46 }
 0x2d4   : > { %837 = vst.msk [vmem:[%s1542_s13] sm:$0xff] %vm608_vm5, %v821_v49  ;;  %v1158_v51 = vpop.f32.mrb[2].mxu0 }
 0x2d5   : > { %v824_v53 = vmul.f32 %v1158_v51, %v1408_v25  ;;  %v752_v54 = vpop.f32.mrb[3].mxu0 }
 0x2d6   : > { %v823_v56 = vmul.f32 %v752_v54, %v1412_v27 }
 0x2d7   : > { %840 = vst.msk [vmem:[%s1542_s13 + $0x18] sm:$0xff] %vm608_vm5, %v824_v53 }
 0x2d8   : > { %839 = vst.msk [vmem:[%s1542_s13 + $0x10] sm:$0xff] %vm608_vm5, %v823_v56  ;;  %v1161_v20 = vpop.f32.mrb[4].mxu0 }
 0x2d9   : > { %v826_v22 = vmul.f32 %v1161_v20, %v1416_v30  ;;  %v762_v58 = vpop.f32.mrb[5].mxu0 }
 0x2da   : > { %v825_v59 = vmul.f32 %v762_v58, %v1420_v32 }
 0x2db   : > { %842 = vst.msk [vmem:[%s1542_s13 + $0x28] sm:$0xff] %vm608_vm5, %v826_v22 }
 0x2dc   : > { %841 = vst.msk [vmem:[%s1542_s13 + $0x20] sm:$0xff] %vm608_vm5, %v825_v59  ;;  %v1164_v25 = vpop.f32.mrb[6].mxu0 }
 0x2dd   : > { %v828_v27 = vmul.f32 %v1164_v25, %v1424_v35  ;;  %v772_v60 = vpop.f32.mrb[7].mxu0 }
 0x2de   : > { %v827_v61 = vmul.f32 %v772_v60, %v1428_v37 }
 0x2df   : > { %844 = vst.msk [vmem:[%s1542_s13 + $0x38] sm:$0xff] %vm608_vm5, %v828_v27 }
 0x2e0   : > { %843 = vst.msk [vmem:[%s1542_s13 + $0x30] sm:$0xff] %vm608_vm5, %v827_v61  ;;  %v1167_v30 = vpop.f32.mrb[8].mxu0 }
 0x2e1   : > { %v830_v32 = vmul.f32 %v1167_v30, %v1432_v40  ;;  %v782_v62 = vpop.f32.mrb[9].mxu0 }
 0x2e2   : > { %v829_v63 = vmul.f32 %v782_v62, %v1436_v42 }
 0x2e3   : > { %846 = vst.msk [vmem:[%s1542_s13 + $0x48] sm:$0xff] %vm608_vm5, %v830_v32 }
 0x2e4   : > { %845 = vst.msk [vmem:[%s1542_s13 + $0x40] sm:$0xff] %vm608_vm5, %v829_v63  ;;  %v1170_v35 = vpop.f32.mrb[10].mxu0 }
 0x2e5   : > { %v832_v37 = vmul.f32 %v1170_v35, %v1440_v45  ;;  %v792_v0 = vpop.f32.mrb[11].mxu0 }
 0x2e6   : > { %v831_v1 = vmul.f32 %v792_v0, %v1444_v47 }
 0x2e7   : > { %848 = vst.msk [vmem:[%s1542_s13 + $0x58] sm:$0xff] %vm608_vm5, %v832_v37 }
 0x2e8   : > { %847 = vst.msk [vmem:[%s1542_s13 + $0x50] sm:$0xff] %vm608_vm5, %v831_v1  ;;  %v1173_v40 = vpop.f32.mrb[12].mxu0 }
 0x2e9   : > { %v834_v2 = vmul.f32 %v1173_v40, %v1448_v50  ;;  %v802_v42 = vpop.f32.mrb[13].mxu0 }
 0x2ea   : > { %v833_v3 = vmul.f32 %v802_v42, %v1452_v52 }
 0x2eb   : > { %850 = vst.msk [vmem:[%s1542_s13 + $0x68] sm:$0xff] %vm608_vm5, %v834_v2 }
 0x2ec   : > { %849 = vst.msk [vmem:[%s1542_s13 + $0x60] sm:$0xff] %vm608_vm5, %v833_v3  ;;  %v1176_v4 = vpop.f32.mrb[14].mxu0 }
 0x2ed   : > { %v836_v45 = vmul.f32 %v1176_v4, %v1456_v55  ;;  %v812_v5 = vpop.f32.mrb[15].mxu0 }
 0x2ee   : > { %v835_v47 = vmul.f32 %v812_v5, %v1460_v57 }
 0x2ef   : > { %852 = vst.msk [vmem:[%s1542_s13 + $0x78] sm:$0xff] %vm608_vm5, %v836_v45 }
 0x2f0   : > { %851 = vst.msk [vmem:[%s1542_s13 + $0x70] sm:$0xff] %vm608_vm5, %v835_v47 }
 0x2f1 PF: > { %s16_s20 = sadd.s32 1, %s1274_s20   ;;  %s1607_s18 = smov %s1270_s19 }
 0x2f2   : > { %p13_p5 = scmp.ge.s32.totalorder %s16_s20, 4   ;;  %s1608_s19 = smov %s1610_s21 }
 0x2f4   :  { %15 = sbr.rel (!%p13_p5) target bundleno = 2 (0x2), region = 78 }

</bundles_post_ra>
